<compile_context>
chip_gen: v7x
topology: tpu7x:2x2x1
jax: 0.10.0
libtpu: 0.0.40
codegen_flags: <defaults>
</compile_context>

<pallas_src>
import functools

import jax
import jax.numpy as jnp
from jax.experimental import pallas as pl
from jax.experimental.pallas import tpu as pltpu


# ---------------------------------------------------------------------------
# Kernel
# ---------------------------------------------------------------------------
def _make_kernel(margin: float, true_b: int, tile_b: int, d: int):
    """Kernel body with margin / true batch size / tile geometry baked in."""
    # Use chunked (VPU-add) accumulation when the feature dim is a clean
    # multiple of the 128-lane width; otherwise fall back to a plain reduce.
    n_chunks = d // 128 if (d % 128 == 0 and d > 128) else 0

    def row_sq_dist(x, y):
        diff = x - y
        sq = diff * diff                                   # (tile_b, d) f32
        if n_chunks:
            acc = sq[:, 0:128]
            for c in range(1, n_chunks):                   # VPU adds, lane-aligned slices
                acc = acc + sq[:, c * 128:(c + 1) * 128]
            return jnp.sum(acc, axis=1, keepdims=True)     # single cross-lane reduce
        return jnp.sum(sq, axis=1, keepdims=True)          # (tile_b, 1)

    def kernel(a_ref, p_ref, n_ref, out_ref):
        a = a_ref[...].astype(jnp.float32)
        p = p_ref[...].astype(jnp.float32)
        n = n_ref[...].astype(jnp.float32)

        d_pos = row_sq_dist(a, p)
        d_neg_a = row_sq_dist(a, n)
        d_neg_b = row_sq_dist(p, n)

        losses = jnp.maximum(
            d_pos - (d_neg_a + d_neg_b) * 0.5 + margin, 0.0
        )                                                  # (tile_b, 1)

        # Mask rows that are pure padding (last tile) so they contribute 0.
        tile_start = pl.program_id(0) * tile_b
        row_ids = tile_start + jax.lax.broadcasted_iota(jnp.int32, (tile_b, 1), 0)
        losses = jnp.where(row_ids < true_b, losses, 0.0)

        # Per-tile partial sum, written as a lane-dense (1, 8, 128) splat so the
        # grid axis carries no accumulator and can be marked "parallel".
        partial = jnp.sum(losses)
        out_ref[...] = jnp.broadcast_to(partial, out_ref.shape).astype(jnp.float32)

    return kernel


# ---------------------------------------------------------------------------
# Tile sizing
# ---------------------------------------------------------------------------
def _round_up(x: int, m: int) -> int:
    return ((x + m - 1) // m) * m


def _choose_tile_b(b: int, d: int, itemsize: int) -> int:
    # VMEM cost per grid step = 3 inputs x 2 pipeline buffers x tile_b x d x itemsize.
    # Budget ~20 MiB keeps double-buffering alive on v5e (16 MiB default raised
    # below), v6e (32 MiB default) and v7x (64 MiB physical / 32 MiB scoped).
    budget_bytes = 20 * 1024 * 1024
    max_rows = max(8, budget_bytes // (6 * d * itemsize))
    tile = min(max_rows, 1024, _round_up(b, 8))
    if tile >= 128:
        tile = (tile // 128) * 128     # keep large tiles sublane/lane friendly
    else:
        tile = max(8, (tile // 8) * 8)
    return tile


# ---------------------------------------------------------------------------
# Wrapper
# ---------------------------------------------------------------------------
@functools.partial(jax.jit, static_argnames=("margin", "tile_b"))
def triplet_loss(anchor, positive, negative, margin: float = 1.0, tile_b=None):
    """Pallas TPU implementation of TripletLoss.forward (returns a scalar)."""
    assert anchor.shape == positive.shape == negative.shape
    assert anchor.ndim == 2, "expected (batch, features) inputs"

    b, d = anchor.shape
    itemsize = jnp.dtype(anchor.dtype).itemsize

    if tile_b is None:
        tile_b = _choose_tile_b(b, d, itemsize)
    assert tile_b % 8 == 0, "tile_b must be a multiple of 8 (sublane width)"

    b_pad = _round_up(b, tile_b)
    num_tiles = b_pad // tile_b

    if b_pad != b:
        pad = ((0, b_pad - b), (0, 0))
        anchor = jnp.pad(anchor, pad)
        positive = jnp.pad(positive, pad)
        negative = jnp.pad(negative, pad)

    kernel = _make_kernel(float(margin), b, tile_b, d)

    # Advisory scheduler hint: this call is almost pure HBM traffic.
    bytes_accessed = 3 * b_pad * d * itemsize + num_tiles * 8 * 128 * 4
    cost = pl.CostEstimate(
        flops=9 * b_pad * d, transcendentals=0, bytes_accessed=bytes_accessed
    )

    partials = pl.pallas_call(
        kernel,
        out_shape=jax.ShapeDtypeStruct((num_tiles, 8, 128), jnp.float32),
        grid=(num_tiles,),
        in_specs=[
            pl.BlockSpec((tile_b, d), lambda i: (i, 0)),
            pl.BlockSpec((tile_b, d), lambda i: (i, 0)),
            pl.BlockSpec((tile_b, d), lambda i: (i, 0)),
        ],
        out_specs=pl.BlockSpec((1, 8, 128), lambda i: (i, 0, 0)),
        compiler_params=pltpu.CompilerParams(
            dimension_semantics=("parallel",),          # no carried state -> both TCs on v7x
            vmem_limit_bytes=32 * 1024 * 1024,          # raise v5e's 16 MiB default
        ),
        cost_estimate=cost,
    )(anchor, positive, negative)

    # Tiny final reduction in plain JAX: global sum of per-tile partials,
    # divided by the TRUE batch size (padded rows were masked to 0 in-kernel).
    return jnp.sum(partials[:, 0, 0]) / b


# ---------------------------------------------------------------------------
# Plain-JAX reference (mirrors the PyTorch forward exactly)
# ---------------------------------------------------------------------------
def triplet_loss_ref(anchor, positive, negative, margin=1.0):
    anchor = anchor.astype(jnp.float32)
    positive = positive.astype(jnp.float32)
    negative = negative.astype(jnp.float32)
    d_pos = jnp.sum((anchor - positive) ** 2, axis=1)
    d_neg_a = jnp.sum((anchor - negative) ** 2, axis=1)
    d_neg_b = jnp.sum((positive - negative) ** 2, axis=1)
    losses = jax.nn.relu(d_pos - (d_neg_a + d_neg_b) / 2.0 + margin)
    return jnp.mean(losses)


if __name__ == "__main__":
    key = jax.random.PRNGKey(0)

    cases = [
        # Small embedding batch consistent with the module's forward.
        dict(B=8, D=32, dtype=jnp.float32, tile_b=None),
        # Multi-tile grid + padded/masked last tile (20 rows, tile of 8).
        dict(B=20, D=256, dtype=jnp.float32, tile_b=8),
        # bf16 inputs (half the HBM traffic), chunked lane reduction (D = 3*128).
        dict(B=16, D=384, dtype=jnp.bfloat16, tile_b=None),
    ]

    for idx, c in enumerate(cases):
        ka, kp, kn = jax.random.split(jax.random.fold_in(key, idx), 3)
        a = jax.random.normal(ka, (c["B"], c["D"]), dtype=jnp.float32).astype(c["dtype"])
        p = jax.random.normal(kp, (c["B"], c["D"]), dtype=jnp.float32).astype(c["dtype"])
        n = jax.random.normal(kn, (c["B"], c["D"]), dtype=jnp.float32).astype(c["dtype"])

        out = triplet_loss(a, p, n, margin=1.0, tile_b=c["tile_b"])
        out = jax.block_until_ready(out)

        ref = triplet_loss_ref(a, p, n, margin=1.0)
        assert jnp.allclose(out, ref, atol=2e-4, rtol=2e-4), (c, float(out), float(ref))

    print("KERNEL_OK")
</pallas_src>

<mosaic_0001>
module attributes {stable_mosaic.version = 11 : i64} {
  func.func @kernel(%arg0: i32, %arg1: memref<8x32xf32, #tpu.memory_space<vmem>>, %arg2: memref<8x32xf32, #tpu.memory_space<vmem>>, %arg3: memref<8x32xf32, #tpu.memory_space<vmem>>, %arg4: memref<1x8x128xf32, #tpu.memory_space<vmem>>) attributes {dimension_semantics = [#tpu.dimension_semantics<parallel>], iteration_bounds = array<i64: 1>, scalar_prefetch = 0 : i64, scratch_operands = 0 : i64, tpu.core_type = #tpu.core_type<tc>, window_params = [{transform_indices = @transform_0, window_bounds = array<i64: 8, 32>}, {transform_indices = @transform_1, window_bounds = array<i64: 8, 32>}, {transform_indices = @transform_2, window_bounds = array<i64: 8, 32>}, {transform_indices = @transform_3, window_bounds = array<i64: 1, 8, 128>}]} {
    %c0 = arith.constant 0 : index
    %c0_0 = arith.constant 0 : index
    %0 = vector.load %arg1[%c0, %c0_0] : memref<8x32xf32, #tpu.memory_space<vmem>>, vector<8x32xf32>
    %c0_1 = arith.constant 0 : index
    %c0_2 = arith.constant 0 : index
    %1 = vector.load %arg2[%c0_1, %c0_2] : memref<8x32xf32, #tpu.memory_space<vmem>>, vector<8x32xf32>
    %c0_3 = arith.constant 0 : index
    %c0_4 = arith.constant 0 : index
    %2 = vector.load %arg3[%c0_3, %c0_4] : memref<8x32xf32, #tpu.memory_space<vmem>>, vector<8x32xf32>
    %3 = arith.subf %0, %1 : vector<8x32xf32>
    %4 = arith.mulf %3, %3 : vector<8x32xf32>
    %cst = arith.constant dense<0.000000e+00> : vector<8xf32>
    %5 = vector.multi_reduction <add>, %4, %cst [1] : vector<8x32xf32> to vector<8xf32>
    %6 = vector.shape_cast %5 : vector<8xf32> to vector<8x1xf32>
    %7 = arith.subf %0, %2 : vector<8x32xf32>
    %8 = arith.mulf %7, %7 : vector<8x32xf32>
    %cst_5 = arith.constant dense<0.000000e+00> : vector<8xf32>
    %9 = vector.multi_reduction <add>, %8, %cst_5 [1] : vector<8x32xf32> to vector<8xf32>
    %10 = vector.shape_cast %9 : vector<8xf32> to vector<8x1xf32>
    %11 = arith.subf %1, %2 : vector<8x32xf32>
    %12 = arith.mulf %11, %11 : vector<8x32xf32>
    %cst_6 = arith.constant dense<0.000000e+00> : vector<8xf32>
    %13 = vector.multi_reduction <add>, %12, %cst_6 [1] : vector<8x32xf32> to vector<8xf32>
    %14 = vector.shape_cast %13 : vector<8xf32> to vector<8x1xf32>
    %15 = arith.addf %10, %14 : vector<8x1xf32>
    %cst_7 = arith.constant 5.000000e-01 : f32
    %16 = vector.broadcast %cst_7 : f32 to vector<8x1xf32>
    %17 = arith.mulf %15, %16 : vector<8x1xf32>
    %18 = arith.subf %6, %17 : vector<8x1xf32>
    %cst_8 = arith.constant 1.000000e+00 : f32
    %19 = vector.broadcast %cst_8 : f32 to vector<8x1xf32>
    %20 = arith.addf %18, %19 : vector<8x1xf32>
    %cst_9 = arith.constant 0.000000e+00 : f32
    %21 = vector.broadcast %cst_9 : f32 to vector<8x1xf32>
    %22 = arith.maximumf %20, %21 : vector<8x1xf32>
    %c8_i32 = arith.constant 8 : i32
    %23 = arith.muli %arg0, %c8_i32 : i32
    %24 = tpu.iota {dimensions = array<i32: 0>} : vector<8x1xi32>
    %25 = vector.broadcast %23 : i32 to vector<8x1xi32>
    %26 = arith.addi %25, %24 : vector<8x1xi32>
    %c8_i32_10 = arith.constant 8 : i32
    %27 = vector.broadcast %c8_i32_10 : i32 to vector<8x1xi32>
    %28 = arith.cmpi slt, %26, %27 : vector<8x1xi32>
    %cst_11 = arith.constant 0.000000e+00 : f32
    %29 = vector.broadcast %cst_11 : f32 to vector<8x1xf32>
    %30 = arith.select %28, %22, %29 : vector<8x1xi1>, vector<8x1xf32>
    %31 = vector.shape_cast %30 : vector<8x1xf32> to vector<1x8x1xf32>
    %cst_12 = arith.constant dense<0.000000e+00> : vector<1xf32>
    %32 = vector.multi_reduction <add>, %31, %cst_12 [1, 2] : vector<1x8x1xf32> to vector<1xf32>
    %33 = vector.shape_cast %32 : vector<1xf32> to vector<1x1x1xf32>
    %34 = vector.extract %33[0, 0, 0] : f32 from vector<1x1x1xf32>
    %35 = vector.broadcast %34 : f32 to vector<1x8x128xf32>
    %c0_13 = arith.constant 0 : index
    %c0_14 = arith.constant 0 : index
    %c0_15 = arith.constant 0 : index
    %36 = vector.load %arg4[%c0_13, %c0_14, %c0_15] : memref<1x8x128xf32, #tpu.memory_space<vmem>>, vector<1x8x128xf32>
    tpu.vector_store %arg4[%c0_13, %c0_14, %c0_15], %35 {strides = array<i32>} : memref<1x8x128xf32, #tpu.memory_space<vmem>>, vector<1x8x128xf32>,
    return
  }
  func.func @transform_0(%arg0: i32) -> (i32, i32) {
    %c0_i32 = arith.constant 0 : i32
    %c0_i32_0 = arith.constant 0 : i32
    return %arg0, %c0_i32 : i32, i32
  }
  func.func @transform_1(%arg0: i32) -> (i32, i32) {
    %c0_i32 = arith.constant 0 : i32
    %c0_i32_0 = arith.constant 0 : i32
    return %arg0, %c0_i32 : i32, i32
  }
  func.func @transform_2(%arg0: i32) -> (i32, i32) {
    %c0_i32 = arith.constant 0 : i32
    %c0_i32_0 = arith.constant 0 : i32
    return %arg0, %c0_i32 : i32, i32
  }
  func.func @transform_3(%arg0: i32) -> (i32, i32, i32) {
    %c0_i32 = arith.constant 0 : i32
    %c0_i32_0 = arith.constant 0 : i32
    %c0_i32_1 = arith.constant 0 : i32
    return %arg0, %c0_i32, %c0_i32_0 : i32, i32, i32
  }
}

</mosaic_0001>

<bundles_post_ra>
// kernel: triplet_loss.1
= control target key start
LH: loop header
LB: loop body
LE: loop exit
PB: predicated region body
PF: predicated region fallthrough
CT: control target
= control target key end

     0   :  { %8 = vsyncpa [#allocation3], 0  ;;  %s236_s0 = inlined_call_operand.hbm [shape: f32[8,32], index: 0, kind: input, shape index: {}]   ;;  %s237_s1 = inlined_call_operand.hbm [shape: f32[8,32], index: 1, kind: input, shape index: {}]   ;;  %s238_s2 = inlined_call_operand.hbm [shape: f32[8,32], index: 2, kind: input, shape index: {}]   ;;  %s239_s3 = inlined_call_operand.vmem [shape: f32[1,8,128], index: 3, kind: output, shape index: {}]  }
   0x1   :  { %9 = vsyncpa [#allocation5], 0  ;;  %s174_s12 = smov [#allocation4]   ;;  %s175_s14 = smov [#allocation2]  }
   0x2   :  { %s26_s13 = sshll.u32 %s174_s12, 4  ;;  %s16_s15 = sshll.u32 %s175_s14, 4  ;;  %s27_s13 = int_to_ptr.vmem [resolvable:$true] %s26_s13  ;;  %s17_s15 = int_to_ptr.vmem [resolvable:$true] %s16_s15 }
   0x3   :  { %s104_s18 = scalar_lea.hbm %s237_s1, 128 }
   0x4   :  { %p105_p0 = scmp.ne.s32.totalorder %s237_s1, %s104_s18  ;;  %p108_p1 = scmp.lt.u32.totalorder %s104_s18, %s237_s1 }
   0x6   :  { %p110_p2 = pnand %p108_p1, %p105_p0 }
   0x8   :  { %113 = shalt.err (!%p110_p2)
}
   0x9   :  { %s114_s23 = scalar_lea.vmem %s27_s13, 128  ;;  %p119_p4 = scmp.lt.s32.totalorder %s27_s13, %s27_s13 }
   0xa   :  { %p115_p3 = scmp.ne.s32.totalorder %s27_s13, %s114_s23  ;;  %p120_p5 = scmp.lt.s32.totalorder %s114_s23, %s114_s23 }
   0xc   :  { %p121_p6 = por %p120_p5, %p119_p4 }
   0xe   :  { %p122_p7 = pnand %p121_p6, %p115_p3 }
  0x10   :  { %125 = shalt.err (!%p122_p7)
}
  0x11   :  { %29 = dma.hbm_to_vmem [thread:$0]  %s237_s1, 128, %s27_s13, [#allocation5]  }
  0x12   :  { %s126_s28 = scalar_lea.hbm %s236_s0, 128 }
  0x13   :  { %p127_p8 = scmp.ne.s32.totalorder %s236_s0, %s126_s28  ;;  %p130_p9 = scmp.lt.u32.totalorder %s126_s28, %s236_s0 }
  0x15   :  { %p132_p10 = pnand %p130_p9, %p127_p8 }
  0x17   :  { %135 = shalt.err (!%p132_p10)
}
  0x18   :  { %s136_s6 = scalar_lea.vmem %s17_s15, 128  ;;  %p141_p12 = scmp.lt.s32.totalorder %s17_s15, %s17_s15 }
  0x19   :  { %p137_p11 = scmp.ne.s32.totalorder %s17_s15, %s136_s6  ;;  %p142_p13 = scmp.lt.s32.totalorder %s136_s6, %s136_s6 }
  0x1b   :  { %p143_p0 = por %p142_p13, %p141_p12 }
  0x1d   :  { %p144_p1 = pnand %p143_p0, %p137_p11 }
  0x1f   :  { %147 = shalt.err (!%p144_p1)
}
  0x20   :  { %19 = dma.hbm_to_vmem [thread:$0]  %s236_s0, 128, %s17_s15, [#allocation3]  }
  0x21   :  { %s176_s8 = smov [#allocation6]   ;;  %s148_s12 = scalar_lea.hbm %s238_s2, 128 }
  0x22   :  { %s36_s9 = sshll.u32 %s176_s8, 4  ;;  %p149_p2 = scmp.ne.s32.totalorder %s238_s2, %s148_s12  ;;  %s37_s9 = int_to_ptr.vmem [resolvable:$true] %s36_s9 }
  0x23   :  { %p152_p3 = scmp.lt.u32.totalorder %s148_s12, %s238_s2 }
  0x25   :  { %p154_p4 = pnand %p152_p3, %p149_p2 }
  0x27   :  { %157 = shalt.err (!%p154_p4)
}
  0x28   :  { %s158_s18 = scalar_lea.vmem %s37_s9, 128  ;;  %p163_p6 = scmp.lt.s32.totalorder %s37_s9, %s37_s9 }
  0x29   :  { %p159_p5 = scmp.ne.s32.totalorder %s37_s9, %s158_s18  ;;  %p164_p7 = scmp.lt.s32.totalorder %s158_s18, %s158_s18 }
  0x2b   :  { %p165_p8 = por %p164_p7, %p163_p6 }
  0x2d   :  { %p166_p9 = pnand %p165_p8, %p159_p5 }
  0x2f   :  { %169 = shalt.err (!%p166_p9)
}
  0x30   :  { %39 = dma.hbm_to_vmem [thread:$0]  %s238_s2, 128, %s37_s9, [#allocation5]  }
  0x31   :  { %170 = dma.done.wait [#allocation3], 128  }
  0x32   :  { %171 = vsyncadd [#allocation3], 4294967168 }
  0x33   :  { %172 = dma.done.wait [#allocation5], 256  }
  0x34   :  { %173 = vsyncadd [#allocation5], 4294967040  ;;  %v49_v0 = vld [vmem:[#allocation2] sm:$0xff]  ;;  %v51_v1 = vld [vmem:[#allocation6] sm:$0xff]  ;;  %vm54_vm0 = vcmask 261120   ;;  %vm80_vm1 = vcmask 7168  }
  0x35   :  { %v50_v2 = vld [vmem:[#allocation4] sm:$0xff]  ;;  %v58_v3 = vsub.f32 %v49_v0, %v51_v1 }
  0x36   :  { %v63_v4 = vsub.f32 %v50_v2, %v51_v1  ;;  %v52_v5 = vsub.f32 %v49_v0, %v50_v2 }
  0x37   :  { %v59_v6 = vmul.f32 %v58_v3, %v58_v3 }
  0x38   :  { %v64_v7 = vmul.f32 %v63_v4, %v63_v4  ;;  %v53_v8 = vmul.f32 %v52_v5, %v52_v5 }
  0x39   :  { %v60_v9 = vsel %vm54_vm0, %v59_v6, 0.0 }
  0x3a   :  { %v55_v10 = vsel %vm54_vm0, %v53_v8, 0.0  ;;  %61 = vadd.xlane.f32.xlu0 %v60_v9  ;;  %v65_v11 = vsel %vm54_vm0, %v64_v7, 0.0 }
  0x3b   :  { %56 = vadd.xlane.f32.xlu1 %v55_v10 }
  0x3e   :  { %66 = vadd.xlane.f32.xlu0 %v65_v11 }
  0xc7   :  { %v62_v12 = vpop.xlane.xlu0 %61 }
  0xc8   :  { %v57_v15 = vpop.xlane.xlu1 %56 }
  0xcb   :  { %v67_v13 = vpop.xlane.xlu0 %66 }
  0xcc   :  { %v68_v14 = vadd.f32 %v67_v13, %v62_v12 }
  0xce   :  { %v69_v16 = vmul.f32 0.5, %v68_v14 }
  0xd0   :  { %v70_v17 = vsub.f32 %v57_v15, %v69_v16 }
  0xd2   :  { %v71_v18 = vadd.f32 1.0, %v70_v17 }
  0xd4   :  { %v72_v19 = vmax.f32 %v71_v18, 0.0 }
  0xd6   :  { %v81_v20 = vsel %vm80_vm1, %v72_v19, 0.0 }
  0xd7   :  { %82 = vadd.xlane.f32.xlu1 %v81_v20 }
 0x164   :  { %v83_v21 = vpop.xlane.xlu1 %82 }
 0x165   :  { %v84_v22 = vrot.slane %v83_v21, 4 }
 0x167   :  { %v85_v23 = vadd.f32 %v84_v22, %v83_v21 }
 0x169   :  { %v86_v24 = vrot.slane %v85_v23, 2 }
 0x16b   :  { %v87_v25 = vadd.f32 %v86_v24, %v85_v23 }
 0x16d   :  { %v88_v26 = vrot.slane %v87_v25, 1 }
 0x16f   :  { %v89_v27 = vadd.f32 %v88_v26, %v87_v25 }
 0x171   :  { %99 = vpush %v89_v27 }
 0x1a2   :  { %s100_s2 = spop %99 }
 0x1a3   :  { %v91_v28 = vstv %s100_s2 }
 0x1a4   :  { %92 = vst [vmem:[%s239_s3] sm:$0xff] %v91_v28 }
 0x1a5   :  { %97 = vsyncpa [#allocation3], 1 }
 0x1a6   :  { %98 = vsyncpa [#allocation5], 1 }

</bundles_post_ra>
